<compile_context>
chip_gen: v7x
topology: tpu7x:2x2x1
jax: 0.10.0
libtpu: 0.0.40
codegen_flags: <defaults>
</compile_context>

<pallas_src>
import functools

import jax
import jax.numpy as jnp
from jax.experimental import pallas as pl
from jax.experimental.pallas import tpu as pltpu


def _round_up(x, m):
    return ((x + m - 1) // m) * m


def _patch_embed_kernel_2d(x_ref, w_ref, b_ref, o_ref):
    # X tile (tm, K) bf16, W tile (K, tn) bf16, bias (1, tn) f32.
    # Single MXU matmul, f32 accumulate, fused bias, lane-dense f32 store.
    o_ref[...] = (
        jnp.dot(x_ref[...], w_ref[...], preferred_element_type=jnp.float32)
        + b_ref[...]
    ).astype(o_ref.dtype)


def _patch_embed_kernel_3d(x_ref, w_ref, b_ref, o_ref, acc_ref):
    # K-tiled variant: acc (tm, tn) f32 resident across the K ("arbitrary")
    # grid axis; bias add + store on the last K step only.
    k = pl.program_id(2)

    @pl.when(k == 0)
    def _():
        acc_ref[...] = jnp.zeros_like(acc_ref)

    acc_ref[...] += jnp.dot(
        x_ref[...], w_ref[...], preferred_element_type=jnp.float32
    )

    @pl.when(k == pl.num_programs(2) - 1)
    def _():
        o_ref[...] = (acc_ref[...] + b_ref[...]).astype(o_ref.dtype)


@functools.partial(jax.jit, static_argnames=("patch_size", "tm", "tn", "tk"))
def patch_embedding_forward(x, weight, bias, *, patch_size, tm=512, tn=1024, tk=512):
    """x: (B, C, H, W) NCHW float32.
    weight: (emb, C, p, p) PyTorch Conv2d layout.  bias: (emb,).
    Returns (B, num_patches, emb) float32."""
    B, C, H, W = x.shape
    p = patch_size
    emb = weight.shape[0]
    assert H % p == 0 and W % p == 0
    nh, nw = H // p, W // p
    num_patches = nh * nw

    # --- glue: cast to bf16 FIRST (halves transpose traffic), then extract
    # non-overlapping patches, flattened in (C, ph, pw) order to match the
    # PyTorch conv-weight flatten order. ---
    xb = x.astype(jnp.bfloat16)
    xp = xb.reshape(B, C, nh, p, nw, p)
    xp = jnp.transpose(xp, (0, 2, 4, 1, 3, 5))
    X = xp.reshape(B * num_patches, C * p * p)

    # conv weight (emb, C, p, p) -> (C*p*p, emb), bf16 for the MXU.
    Wt = jnp.transpose(weight.reshape(emb, C * p * p)).astype(jnp.bfloat16)
    b2 = bias.reshape(1, emb).astype(jnp.float32)

    M, K = X.shape
    N = emb

    # --- tile sizes ---
    # sublane dim (tm): multiple of 16 (bf16 packing); lane dims multiples of
    # 128 (lane-dense, unmasked stores).  Keep K untiled when it fits (typical
    # ViT K = C*p*p <= 2048); keep N untiled when <= 1024 so the output store
    # is one big lane-dense slab and the weight tile stays VMEM-resident.
    tm_eff = min(tm, _round_up(M, 16))

    n128 = _round_up(N, 128)
    tn_eff = n128 if n128 <= max(tn, 128) else 256

    k128 = _round_up(K, 128)
    tk_eff = k128 if k128 <= 2048 else tk

    Mp = _round_up(M, tm_eff)
    Np = _round_up(N, tn_eff)
    Kp = _round_up(K, tk_eff)

    # Zero padding: padded K rows/cols contribute nothing to the dot; padded
    # M rows / N cols are sliced off below.  (No-op when already aligned.)
    if (Mp, Kp) != (M, K):
        X = jnp.pad(X, ((0, Mp - M), (0, Kp - K)))
    if (Kp, Np) != (K, N):
        Wt = jnp.pad(Wt, ((0, Kp - K), (0, Np - N)))
    if Np != N:
        b2 = jnp.pad(b2, ((0, 0), (0, Np - N)))

    n_k = Kp // tk_eff
    cost = pl.CostEstimate(
        flops=2 * Mp * Np * Kp,
        transcendentals=0,
        bytes_accessed=Mp * Kp * 2 + Kp * Np * 2 + Mp * Np * 4,
    )

    if n_k == 1:
        # 2-D grid: no accumulator scratch, no pl.when, one matmul per step.
        out = pl.pallas_call(
            _patch_embed_kernel_2d,
            out_shape=jax.ShapeDtypeStruct((Mp, Np), jnp.float32),
            grid_spec=pltpu.PrefetchScalarGridSpec(
                num_scalar_prefetch=0,
                grid=(Mp // tm_eff, Np // tn_eff),
                in_specs=[
                    pl.BlockSpec((tm_eff, Kp), lambda i, j: (i, 0)),
                    pl.BlockSpec((Kp, tn_eff), lambda i, j: (0, j)),
                    pl.BlockSpec((1, tn_eff), lambda i, j: (0, j)),
                ],
                out_specs=pl.BlockSpec((tm_eff, tn_eff), lambda i, j: (i, j)),
            ),
            compiler_params=pltpu.CompilerParams(
                dimension_semantics=("parallel", "parallel"),
                vmem_limit_bytes=32 * 1024 * 1024,
            ),
            cost_estimate=cost,
        )(X, Wt, b2)
    else:
        # 3-D grid with K reduction axis last ("arbitrary") and f32 VMEM acc.
        out = pl.pallas_call(
            _patch_embed_kernel_3d,
            out_shape=jax.ShapeDtypeStruct((Mp, Np), jnp.float32),
            grid_spec=pltpu.PrefetchScalarGridSpec(
                num_scalar_prefetch=0,
                grid=(Mp // tm_eff, Np // tn_eff, n_k),
                in_specs=[
                    pl.BlockSpec((tm_eff, tk_eff), lambda i, j, k: (i, k)),
                    pl.BlockSpec((tk_eff, tn_eff), lambda i, j, k: (k, j)),
                    pl.BlockSpec((1, tn_eff), lambda i, j, k: (0, j)),
                ],
                out_specs=pl.BlockSpec((tm_eff, tn_eff), lambda i, j, k: (i, j)),
                scratch_shapes=[pltpu.VMEM((tm_eff, tn_eff), jnp.float32)],
            ),
            compiler_params=pltpu.CompilerParams(
                dimension_semantics=("parallel", "parallel", "arbitrary"),
                vmem_limit_bytes=32 * 1024 * 1024,
            ),
            cost_estimate=cost,
        )(X, Wt, b2)

    out = out[:M, :N]
    return out.reshape(B, num_patches, emb)


def reference_forward(x, weight, bias, patch_size):
    """Pure-JAX f32 reference identical to PyTorch Conv2d(stride=kernel)+flatten+transpose."""
    y = jax.lax.conv_general_dilated(
        x, weight,
        window_strides=(patch_size, patch_size),
        padding="VALID",
        dimension_numbers=("NCHW", "OIHW", "NCHW"),
    ) + bias.reshape(1, -1, 1, 1)
    B, E, Hp, Wp = y.shape
    return jnp.transpose(y.reshape(B, E, Hp * Wp), (0, 2, 1))


if __name__ == "__main__":
    # Small shapes consistent with the module:
    B, C, H, W = 2, 4, 16, 16
    patch_size = 8
    emb_size = 32

    key = jax.random.PRNGKey(0)
    kx, kw, kb = jax.random.split(key, 3)

    x = jax.random.normal(kx, (B, C, H, W), dtype=jnp.float32)
    # Deterministic parameter init (same shapes as nn.Conv2d(C, emb, p, stride=p)):
    fan_in = C * patch_size * patch_size
    bound = 1.0 / (fan_in ** 0.5)
    weight = jax.random.uniform(
        kw, (emb_size, C, patch_size, patch_size),
        minval=-bound, maxval=bound, dtype=jnp.float32)
    bias = jax.random.uniform(
        kb, (emb_size,), minval=-bound, maxval=bound, dtype=jnp.float32)

    out = patch_embedding_forward(x, weight, bias, patch_size=patch_size)
    out = jax.block_until_ready(out)

    ref = reference_forward(x, weight, bias, patch_size)
    assert out.shape == (B, (H // patch_size) * (W // patch_size), emb_size)
    # bf16 matmul inputs with f32 accumulation: compare vs f32 reference with
    # a bf16-appropriate tolerance.
    assert jnp.allclose(out, ref, atol=2e-2, rtol=2e-2)

    print("KERNEL_OK")
</pallas_src>

<mosaic_0001>
module attributes {stable_mosaic.version = 11 : i64} {
  func.func @_patch_embed_kernel_2d(%arg0: i32, %arg1: i32, %arg2: memref<16x256xbf16, #tpu.memory_space<vmem>>, %arg3: memref<256x128xbf16, #tpu.memory_space<vmem>>, %arg4: memref<1x128xf32, #tpu.memory_space<vmem>>, %arg5: memref<16x128xf32, #tpu.memory_space<vmem>>) attributes {dimension_semantics = [#tpu.dimension_semantics<parallel>, #tpu.dimension_semantics<parallel>], iteration_bounds = array<i64: 1, 1>, scalar_prefetch = 0 : i64, scratch_operands = 0 : i64, tpu.core_type = #tpu.core_type<tc>, window_params = [{transform_indices = @transform_0, window_bounds = array<i64: 16, 256>}, {transform_indices = @transform_1, window_bounds = array<i64: 256, 128>}, {transform_indices = @transform_2, window_bounds = array<i64: 1, 128>}, {transform_indices = @transform_3, window_bounds = array<i64: 16, 128>}]} {
    %c0 = arith.constant 0 : index
    %c0_0 = arith.constant 0 : index
    %0 = vector.load %arg2[%c0, %c0_0] : memref<16x256xbf16, #tpu.memory_space<vmem>>, vector<16x256xbf16>
    %c0_1 = arith.constant 0 : index
    %c0_2 = arith.constant 0 : index
    %1 = vector.load %arg3[%c0_1, %c0_2] : memref<256x128xbf16, #tpu.memory_space<vmem>>, vector<256x128xbf16>
    %cst = arith.constant dense<0.000000e+00> : vector<16x128xf32>
    %2 = tpu.matmul %0, %1, %cst {dimension_numbers = #tpu.dot_dimension_numbers<[1], [0], [0], [1], [0, 0, 1, 1], [], []>} : vector<16x256xbf16>, vector<256x128xbf16>, vector<16x128xf32> -> vector<16x128xf32>
    %c0_3 = arith.constant 0 : index
    %c0_4 = arith.constant 0 : index
    %3 = vector.load %arg4[%c0_3, %c0_4] : memref<1x128xf32, #tpu.memory_space<vmem>>, vector<1x128xf32>
    %4 = vector.broadcast %3 : vector<1x128xf32> to vector<16x128xf32>
    %5 = arith.addf %2, %4 : vector<16x128xf32>
    %c0_5 = arith.constant 0 : index
    %c0_6 = arith.constant 0 : index
    %6 = vector.load %arg5[%c0_5, %c0_6] : memref<16x128xf32, #tpu.memory_space<vmem>>, vector<16x128xf32>
    tpu.vector_store %arg5[%c0_5, %c0_6], %5 {strides = array<i32>} : memref<16x128xf32, #tpu.memory_space<vmem>>, vector<16x128xf32>,
    return
  }
  func.func @transform_0(%arg0: i32, %arg1: i32) -> (i32, i32) {
    %c0_i32 = arith.constant 0 : i32
    %c0_i32_0 = arith.constant 0 : i32
    return %arg0, %c0_i32 : i32, i32
  }
  func.func @transform_1(%arg0: i32, %arg1: i32) -> (i32, i32) {
    %c0_i32 = arith.constant 0 : i32
    %c0_i32_0 = arith.constant 0 : i32
    return %c0_i32, %arg1 : i32, i32
  }
  func.func @transform_2(%arg0: i32, %arg1: i32) -> (i32, i32) {
    %c0_i32 = arith.constant 0 : i32
    %c0_i32_0 = arith.constant 0 : i32
    return %c0_i32, %arg1 : i32, i32
  }
  func.func @transform_3(%arg0: i32, %arg1: i32) -> (i32, i32) {
    %c0_i32 = arith.constant 0 : i32
    return %arg0, %arg1 : i32, i32
  }
}

</mosaic_0001>

<bundles_post_ra>
// kernel: patch_embedding_forward.1
= control target key start
LH: loop header
LB: loop body
LE: loop exit
PB: predicated region body
PF: predicated region fallthrough
CT: control target
= control target key end

     0   :  { %s352_s1 = inlined_call_operand.vmem [shape: bf16[256,128], index: 1, kind: input, shape index: {}]   ;;  %s353_s0 = inlined_call_operand.vmem [shape: bf16[16,256], index: 0, kind: input, shape index: {}]   ;;  %s354_s2 = inlined_call_operand.vmem [shape: f32[1,128], index: 2, kind: input, shape index: {}]   ;;  %s355_s3 = inlined_call_operand.vmem [shape: f32[16,128], index: 3, kind: output, shape index: {}]  }
   0x1   :  { %v250_v0 = vld [vmem:[%s352_s1 + $0x40] sm:$0xff]   ;;  %v252_v2 = vld [vmem:[%s352_s1 + $0x48] sm:$0xff]   ;;  %v254_v4 = vld [vmem:[%s352_s1 + $0x50] sm:$0xff]  }
   0x2   :  { %v251_v1 = vld [vmem:[%s352_s1] sm:$0xff]   ;;  %228 = vmatprep.subr.bf16.mxu0 %v250_v0  ;;  %v253_v3 = vld [vmem:[%s352_s1 + $0x8] sm:$0xff]   ;;  %v255_v5 = vld [vmem:[%s352_s1 + $0x10] sm:$0xff]  }
   0x3   :  { %229 = vmatpush3.bf16.msra.mxu0 %v251_v1  ;;  %v256_v6 = vld [vmem:[%s352_s1 + $0x58] sm:$0xff]   ;;  %v258_v8 = vld [vmem:[%s352_s1 + $0x60] sm:$0xff]   ;;  %v260_v10 = vld [vmem:[%s352_s1 + $0x68] sm:$0xff]  }
   0x4   :  { %230 = vmatprep.subr.bf16.mxu0 %v252_v2  ;;  %v257_v7 = vld [vmem:[%s352_s1 + $0x18] sm:$0xff]   ;;  %v259_v9 = vld [vmem:[%s352_s1 + $0x20] sm:$0xff]   ;;  %v261_v12 = vld [vmem:[%s352_s1 + $0x28] sm:$0xff]  }
   0x5   :  { %v268_v11 = vld [vmem:[%s353_s0 + $0x4] ss:$8 sps:$4 sm:$0xff]   ;;  %v262_v13 = vld [vmem:[%s352_s1 + $0x70] sm:$0xff]   ;;  %v264_v15 = vld [vmem:[%s352_s1 + $0x78] sm:$0xff]  }
   0x6   :  { %194 = vmatprep.mubr.bf16.mxu0 %v268_v11  ;;  %v263_v14 = vld [vmem:[%s352_s1 + $0x30] sm:$0xff]   ;;  %v265_v16 = vld [vmem:[%s352_s1 + $0x38] sm:$0xff]   ;;  %v266_v17 = vld [vmem:[%s353_s0] ss:$8 sps:$4 sm:$0xff]  }
   0x7   :  { %231 = vmatpush3.bf16.msra.mxu0 %v253_v3  ;;  %v209_v19 = vld [vmem:[%s354_s2] ss:$0 sm:$0xff] }
   0x8   :  { %232 = vmatprep.subr.bf16.mxu0 %v254_v4 }
   0xb   :  { %233 = vmatpush3.bf16.msra.mxu0 %v255_v5 }
   0xc   :  { %234 = vmatprep.subr.bf16.mxu0 %v256_v6 }
   0xf   :  { %235 = vmatpush3.bf16.msra.mxu0 %v257_v7 }
  0x10   :  { %236 = vmatprep.subr.bf16.mxu0 %v258_v8 }
  0x13   :  { %237 = vmatpush3.bf16.msra.mxu0 %v259_v9 }
  0x14   :  { %238 = vmatprep.subr.bf16.mxu0 %v260_v10 }
  0x17   :  { %239 = vmatpush3.bf16.msra.mxu0 %v261_v12 }
  0x18   :  { %240 = vmatprep.subr.bf16.mxu0 %v262_v13 }
  0x1b   :  { %241 = vmatpush3.bf16.msra.mxu0 %v263_v14 }
  0x1c   :  { %242 = vmatprep.subr.bf16.mxu0 %v264_v15 }
  0x1f   :  { %243 = vmatpush3.bf16.msra.mxu0 %v265_v16 }
  0x22   :  { %195 = vmatmul.mubr.bf16.vlgmr.msra.gmra.mrb[0].mxu0 %v266_v17 }
  0xf5   :  { %v244_v18 = vpop.f32.mrb[0].mxu0 }
  0xf6   :  { %v245_v20 = vpop.f32.mrb[1].mxu0 }
  0xf7   :  { %v246_v21 = vadd.f32 %v245_v20, %v244_v18  ;;  %v247_v22 = vpop.f32.mrb[2].mxu0 }
  0xf8   :  { %v248_v23 = vpop.f32.mrb[3].mxu0 }
  0xf9   :  { %v197_v24 = vadd.f32 %v246_v21, %v209_v19  ;;  %v249_v25 = vadd.f32 %v248_v23, %v247_v22 }
  0xfb   :  { %203 = vst [vmem:[%s355_s3] sm:$0xff] %v197_v24  ;;  %v200_v26 = vadd.f32 %v249_v25, %v209_v19 }
  0xfd   :  { %204 = vst [vmem:[%s355_s3 + $0x8] sm:$0xff] %v200_v26 }

</bundles_post_ra>
